<compile_context>
chip_gen: v7x
topology: tpu7x:2x2x1
jax: 0.10.0
libtpu: 0.0.40
codegen_flags: <defaults>
</compile_context>

<pallas_src>
import functools
import math

import jax
import jax.numpy as jnp
from jax.experimental import pallas as pl
from jax.experimental.pallas import tpu as pltpu


# ----------------------------------------------------------------------------
# Fused feed-forward kernel on one transposed tile h = x^T of shape (dim_in, tN)
# ----------------------------------------------------------------------------
def _ffn_kernel(x_ref, *rest, n_layers, layer_norm, eps, compute_dtype):
    wb_refs = rest[: 2 * n_layers]
    idx = 2 * n_layers
    if layer_norm:
        ln_g_ref = rest[idx]
        ln_b_ref = rest[idx + 1]
        idx += 2
    o_ref = rest[idx]

    h = x_ref[...]                                       # (dim_in, tN)
    for i in range(n_layers):
        w = wb_refs[2 * i][...]                          # (out_i, in_i)
        b = wb_refs[2 * i + 1][...]                      # (out_i, 1) f32
        if compute_dtype is not None and h.dtype != compute_dtype:
            h = h.astype(compute_dtype)                  # matmul operand only
        acc = jnp.dot(w, h, preferred_element_type=jnp.float32)   # (out_i, tN)
        acc = acc + b                                    # lane-broadcast bias
        if i < n_layers - 1:
            # Dropout (p=0 / eval) is identity; ReLU on all but the last layer.
            acc = jnp.maximum(acc, 0.0)
        h = acc                                          # stays in VMEM/vregs

    if layer_norm:
        inv_d = 1.0 / h.shape[0]
        s = jnp.sum(h, axis=0, keepdims=True)            # one pass: sum
        sq = jnp.sum(h * h, axis=0, keepdims=True)       #           + sum of squares
        mean = s * inv_d
        var = sq * inv_d - mean * mean
        h = (h - mean) * jax.lax.rsqrt(var + eps)
        h = h * ln_g_ref[...] + ln_b_ref[...]

    o_ref[...] = h.astype(o_ref.dtype)


# ----------------------------------------------------------------------------
# Wrapper: channel-last x (..., dim_in) -> (..., dim_out)
# ----------------------------------------------------------------------------
def feedforward_pallas(x, weights, biases, *, ln_gamma=None, ln_beta=None,
                       eps=1e-5, max_tile_cols=2048, target_grid_steps=8,
                       compute_dtype=None):
    """weights[i]: (out_i, in_i) (PyTorch nn.Linear layout); biases[i]: (out_i,)."""
    n_layers = len(weights)
    layer_norm = ln_gamma is not None
    orig_shape = x.shape
    dim_in = orig_shape[-1]
    dim_out = weights[-1].shape[0]
    out_dtype = x.dtype

    T = math.prod(orig_shape[:-1]) if len(orig_shape) > 1 else 1
    # Lane-dense layout: tokens on the lane axis.  One wrapper transpose of
    # layout plumbing buys unmasked full-width stores / VPU ops in the kernel.
    x_t = x.reshape(T, dim_in).T                          # (dim_in, T)

    if compute_dtype is not None:
        x_t = x_t.astype(compute_dtype)
        weights = [w.astype(compute_dtype) for w in weights]
    biases = [b.reshape(-1, 1).astype(jnp.float32) for b in biases]

    # Tile along T so the grid keeps multiple steps (pipelining + megacore).
    if T <= 128:
        tN = T                                            # full-extent block (legal)
    else:
        n128 = pl.cdiv(T, 128)
        steps = min(target_grid_steps, n128)
        tN = 128 * pl.cdiv(n128, steps)
        tN = min(tN, max(128, (max_tile_cols // 128) * 128))
    grid = (pl.cdiv(T, tN),)                              # ragged tail masked by Pallas

    def _resident(shape):
        # Constant-index blocks are never re-DMA'd -> single-buffer them.
        return pl.BlockSpec(shape, lambda i: (0, 0), pipeline_mode=pl.Buffered(1))

    in_arrays = [x_t]
    in_specs = [pl.BlockSpec((dim_in, tN), lambda i: (0, i))]
    for w, b in zip(weights, biases):
        fout, fin = w.shape
        in_arrays.append(w)
        in_specs.append(_resident((fout, fin)))
        in_arrays.append(b)
        in_specs.append(_resident((fout, 1)))
    if layer_norm:
        in_arrays.append(ln_gamma.reshape(-1, 1).astype(jnp.float32))
        in_specs.append(_resident((dim_out, 1)))
        in_arrays.append(ln_beta.reshape(-1, 1).astype(jnp.float32))
        in_specs.append(_resident((dim_out, 1)))

    # Explicit VMEM budget (v7x: 64 MiB physical / 32 MiB default scoped).
    act_bytes = x_t.dtype.itemsize
    widest = max([dim_in] + [w.shape[0] for w in weights])
    vmem_est = 2 * tN * dim_in * act_bytes                               # x tile (2 bufs)
    vmem_est += 2 * tN * dim_out * jnp.dtype(out_dtype).itemsize         # out tile (2 bufs)
    vmem_est += 2 * tN * widest * 4                                      # f32 intermediates
    for w, b in zip(weights, biases):
        vmem_est += w.size * w.dtype.itemsize + b.size * 4               # resident (1 buf)
    if layer_norm:
        vmem_est += 2 * dim_out * 4
    vmem_limit = int(min(64 << 20, max(16 << 20, 2 * vmem_est + (2 << 20))))

    flops = sum(2 * T * w.shape[0] * w.shape[1] for w in weights)
    bytes_accessed = (x_t.size * act_bytes
                      + T * dim_out * jnp.dtype(out_dtype).itemsize
                      + sum(w.size * w.dtype.itemsize + b.size * 4
                            for w, b in zip(weights, biases)))

    kern = functools.partial(_ffn_kernel, n_layers=n_layers,
                             layer_norm=layer_norm, eps=eps,
                             compute_dtype=compute_dtype)

    out_t = pl.pallas_call(
        kern,
        out_shape=jax.ShapeDtypeStruct((dim_out, T), out_dtype),
        grid=grid,
        in_specs=in_specs,
        out_specs=pl.BlockSpec((dim_out, tN), lambda i: (0, i)),
        compiler_params=pltpu.CompilerParams(
            dimension_semantics=("parallel",),
            vmem_limit_bytes=vmem_limit),
        cost_estimate=pl.CostEstimate(
            flops=flops,
            transcendentals=T if layer_norm else 0,
            bytes_accessed=bytes_accessed),
    )(*in_arrays)

    return out_t.T.reshape(orig_shape[:-1] + (dim_out,))


# ----------------------------------------------------------------------------
# Module-level wrapper mirroring FeedForward.forward
# ----------------------------------------------------------------------------
def _wn_effective_weight(v, g):
    # PyTorch weight_norm(dim=0) on Linear weight (out, in):
    # w[o, :] = g[o] * v[o, :] / ||v[o, :]||
    norm = jnp.sqrt(jnp.sum(v * v, axis=1, keepdims=True))
    return v * (g.reshape(-1, 1) / norm)


def _layer_weight(layer):
    if "g" in layer:
        return _wn_effective_weight(layer["v"], layer["g"])
    return layer["w"]


def feedforward_forward(x, params, *, layer_norm, eps=1e-5,
                        max_tile_cols=2048, target_grid_steps=8,
                        compute_dtype=None):
    weights = [_layer_weight(layer) for layer in params["layers"]]
    biases = [layer["b"] for layer in params["layers"]]
    ln_g = params["ln_gamma"] if layer_norm else None
    ln_b = params["ln_beta"] if layer_norm else None
    return feedforward_pallas(x, weights, biases, ln_gamma=ln_g, ln_beta=ln_b,
                              eps=eps, max_tile_cols=max_tile_cols,
                              target_grid_steps=target_grid_steps,
                              compute_dtype=compute_dtype)


# ----------------------------------------------------------------------------
# Pure-JAX reference (correctness)
# ----------------------------------------------------------------------------
def feedforward_ref(x, params, *, layer_norm, eps=1e-5):
    n_layers = len(params["layers"])
    h = x
    for i, layer in enumerate(params["layers"]):
        w = _layer_weight(layer)                      # (out, in)
        h = h @ w.T + layer["b"]
        if i < n_layers - 1:
            h = jnp.maximum(h, 0.0)
        if layer_norm and i == n_layers - 1:
            mean = jnp.mean(h, axis=-1, keepdims=True)
            var = jnp.mean(jnp.square(h - mean), axis=-1, keepdims=True)
            h = (h - mean) * jax.lax.rsqrt(var + eps)
            h = h * params["ln_gamma"] + params["ln_beta"]
    return h


# ----------------------------------------------------------------------------
# Deterministic synthetic parameter init (PyTorch (out, in) weight layout)
# ----------------------------------------------------------------------------
def init_params(key, dim, factor, n_layers, *, ff_weight_norm, layer_norm):
    keys = jax.random.split(key, n_layers + 1)
    layers = []
    for i in range(n_layers):
        in_dim = dim if i == 0 else dim * factor
        out_dim = dim if i == n_layers - 1 else dim * factor
        kw, kb, kg = jax.random.split(keys[i], 3)
        std = (2.0 / (in_dim + out_dim)) ** 0.5
        w = jax.random.normal(kw, (out_dim, in_dim), jnp.float32) * std
        b = jax.random.normal(kb, (out_dim,), jnp.float32) * 0.01
        if ff_weight_norm:
            g = jax.random.uniform(kg, (out_dim,), jnp.float32, 0.5, 1.5)
            layers.append(dict(v=w, g=g, b=b))
        else:
            layers.append(dict(w=w, b=b))
    params = {"layers": layers}
    if layer_norm:
        kg, kb = jax.random.split(keys[n_layers])
        params["ln_gamma"] = 1.0 + 0.1 * jax.random.normal(kg, (dim,), jnp.float32)
        params["ln_beta"] = 0.01 * jax.random.normal(kb, (dim,), jnp.float32)
    return params


# ----------------------------------------------------------------------------
if __name__ == "__main__":
    key = jax.random.PRNGKey(0)
    kx1, kp1, kx2, kp2 = jax.random.split(key, 4)

    # Config 1: typical F-FNO feed-forward — dim=32, factor=2, 2 layers,
    # weight norm on, layer norm on, channel-last activations (B, M, N, dim).
    DIM, FACTOR, N_LAYERS = 32, 2, 2
    B, M, N = 2, 16, 16                      # T = 512 -> 4 lane tiles of 128
    x = jax.random.normal(kx1, (B, M, N, DIM), jnp.float32)
    params = init_params(kp1, DIM, FACTOR, N_LAYERS,
                         ff_weight_norm=True, layer_norm=True)

    out = jax.block_until_ready(
        feedforward_forward(x, params, layer_norm=True, target_grid_steps=4))
    ref = jax.block_until_ready(feedforward_ref(x, params, layer_norm=True))
    assert out.shape == ref.shape, (out.shape, ref.shape)
    assert jnp.allclose(out, ref, atol=1e-4, rtol=1e-4), \
        float(jnp.max(jnp.abs(out - ref)))

    # Config 2: 3 layers, no weight/layer norm, ragged token count (T=21 -> a
    # single full-extent tile; exercises the non-multiple-of-128 path with no
    # wrapper-side padding or slicing).
    params2 = init_params(kp2, DIM, FACTOR, 3, ff_weight_norm=False,
                          layer_norm=False)
    x2 = jax.random.normal(kx2, (3, 7, DIM), jnp.float32)
    out2 = jax.block_until_ready(
        feedforward_forward(x2, params2, layer_norm=False))
    ref2 = jax.block_until_ready(feedforward_ref(x2, params2, layer_norm=False))
    assert out2.shape == ref2.shape, (out2.shape, ref2.shape)
    assert jnp.allclose(out2, ref2, atol=1e-4, rtol=1e-4), \
        float(jnp.max(jnp.abs(out2 - ref2)))

    # Config 3: bf16 matmul operands (weights/x cast once in the wrapper,
    # f32 accumulation / bias / ReLU / LayerNorm) — looser tolerance expected.
    out3 = jax.block_until_ready(
        feedforward_forward(x, params, layer_norm=True, target_grid_steps=4,
                            compute_dtype=jnp.bfloat16))
    assert out3.shape == ref.shape
    assert jnp.allclose(out3, ref, atol=5e-2, rtol=5e-2), \
        float(jnp.max(jnp.abs(out3 - ref)))

    print("KERNEL_OK")
</pallas_src>

<mosaic_0001>
module attributes {stable_mosaic.version = 11 : i64} {
  func.func @_ffn_kernel(%arg0: i32, %arg1: memref<32x128xf32, #tpu.memory_space<vmem>>, %arg2: memref<64x32xf32, #tpu.memory_space<vmem>>, %arg3: memref<64x1xf32, #tpu.memory_space<vmem>>, %arg4: memref<32x64xf32, #tpu.memory_space<vmem>>, %arg5: memref<32x1xf32, #tpu.memory_space<vmem>>, %arg6: memref<32x1xf32, #tpu.memory_space<vmem>>, %arg7: memref<32x1xf32, #tpu.memory_space<vmem>>, %arg8: memref<32x128xf32, #tpu.memory_space<vmem>>) attributes {dimension_semantics = [#tpu.dimension_semantics<parallel>], iteration_bounds = array<i64: 4>, scalar_prefetch = 0 : i64, scratch_operands = 0 : i64, tpu.core_type = #tpu.core_type<tc>, window_params = [{transform_indices = @transform_0, window_bounds = array<i64: 32, 128>}, {pipeline_mode = #tpu.pipeline_mode<synchronous>, transform_indices = @transform_1, window_bounds = array<i64: 64, 32>}, {pipeline_mode = #tpu.pipeline_mode<synchronous>, transform_indices = @transform_2, window_bounds = array<i64: 64, 1>}, {pipeline_mode = #tpu.pipeline_mode<synchronous>, transform_indices = @transform_3, window_bounds = array<i64: 32, 64>}, {pipeline_mode = #tpu.pipeline_mode<synchronous>, transform_indices = @transform_4, window_bounds = array<i64: 32, 1>}, {pipeline_mode = #tpu.pipeline_mode<synchronous>, transform_indices = @transform_5, window_bounds = array<i64: 32, 1>}, {pipeline_mode = #tpu.pipeline_mode<synchronous>, transform_indices = @transform_6, window_bounds = array<i64: 32, 1>}, {transform_indices = @transform_7, window_bounds = array<i64: 32, 128>}]} {
    %c0 = arith.constant 0 : index
    %c0_0 = arith.constant 0 : index
    %0 = vector.load %arg1[%c0, %c0_0] : memref<32x128xf32, #tpu.memory_space<vmem>>, vector<32x128xf32>
    %c0_1 = arith.constant 0 : index
    %c0_2 = arith.constant 0 : index
    %1 = vector.load %arg2[%c0_1, %c0_2] : memref<64x32xf32, #tpu.memory_space<vmem>>, vector<64x32xf32>
    %c0_3 = arith.constant 0 : index
    %c0_4 = arith.constant 0 : index
    %2 = vector.load %arg3[%c0_3, %c0_4] : memref<64x1xf32, #tpu.memory_space<vmem>>, vector<64x1xf32>
    %cst = arith.constant dense<0.000000e+00> : vector<64x128xf32>
    %3 = tpu.matmul %1, %0, %cst {dimension_numbers = #tpu.dot_dimension_numbers<[1], [0], [0], [1], [0, 0, 1, 1], [], []>} : vector<64x32xf32>, vector<32x128xf32>, vector<64x128xf32> -> vector<64x128xf32>
    %4 = vector.broadcast %2 : vector<64x1xf32> to vector<64x128xf32>
    %5 = arith.addf %3, %4 : vector<64x128xf32>
    %cst_5 = arith.constant 0.000000e+00 : f32
    %6 = vector.broadcast %cst_5 : f32 to vector<64x128xf32>
    %7 = arith.maximumf %5, %6 : vector<64x128xf32>
    %c0_6 = arith.constant 0 : index
    %c0_7 = arith.constant 0 : index
    %8 = vector.load %arg4[%c0_6, %c0_7] : memref<32x64xf32, #tpu.memory_space<vmem>>, vector<32x64xf32>
    %c0_8 = arith.constant 0 : index
    %c0_9 = arith.constant 0 : index
    %9 = vector.load %arg5[%c0_8, %c0_9] : memref<32x1xf32, #tpu.memory_space<vmem>>, vector<32x1xf32>
    %cst_10 = arith.constant dense<0.000000e+00> : vector<32x128xf32>
    %10 = tpu.matmul %8, %7, %cst_10 {dimension_numbers = #tpu.dot_dimension_numbers<[1], [0], [0], [1], [0, 0, 1, 1], [], []>} : vector<32x64xf32>, vector<64x128xf32>, vector<32x128xf32> -> vector<32x128xf32>
    %11 = vector.broadcast %9 : vector<32x1xf32> to vector<32x128xf32>
    %12 = arith.addf %10, %11 : vector<32x128xf32>
    %cst_11 = arith.constant dense<0.000000e+00> : vector<128xf32>
    %13 = vector.multi_reduction <add>, %12, %cst_11 [0] : vector<32x128xf32> to vector<128xf32>
    %14 = vector.shape_cast %13 : vector<128xf32> to vector<1x128xf32>
    %15 = arith.mulf %12, %12 : vector<32x128xf32>
    %cst_12 = arith.constant dense<0.000000e+00> : vector<128xf32>
    %16 = vector.multi_reduction <add>, %15, %cst_12 [0] : vector<32x128xf32> to vector<128xf32>
    %17 = vector.shape_cast %16 : vector<128xf32> to vector<1x128xf32>
    %cst_13 = arith.constant 3.125000e-02 : f32
    %18 = vector.broadcast %cst_13 : f32 to vector<1x128xf32>
    %19 = arith.mulf %14, %18 : vector<1x128xf32>
    %cst_14 = arith.constant 3.125000e-02 : f32
    %20 = vector.broadcast %cst_14 : f32 to vector<1x128xf32>
    %21 = arith.mulf %17, %20 : vector<1x128xf32>
    %22 = arith.mulf %19, %19 : vector<1x128xf32>
    %23 = arith.subf %21, %22 : vector<1x128xf32>
    %24 = vector.broadcast %19 : vector<1x128xf32> to vector<32x128xf32>
    %25 = arith.subf %12, %24 : vector<32x128xf32>
    %cst_15 = arith.constant 9.99999974E-6 : f32
    %26 = vector.broadcast %cst_15 : f32 to vector<1x128xf32>
    %27 = arith.addf %23, %26 : vector<1x128xf32>
    %28 = math.rsqrt %27 : vector<1x128xf32>
    %29 = vector.broadcast %28 : vector<1x128xf32> to vector<32x128xf32>
    %30 = arith.mulf %25, %29 : vector<32x128xf32>
    %c0_16 = arith.constant 0 : index
    %c0_17 = arith.constant 0 : index
    %31 = vector.load %arg6[%c0_16, %c0_17] : memref<32x1xf32, #tpu.memory_space<vmem>>, vector<32x1xf32>
    %32 = vector.broadcast %31 : vector<32x1xf32> to vector<32x128xf32>
    %33 = arith.mulf %30, %32 : vector<32x128xf32>
    %c0_18 = arith.constant 0 : index
    %c0_19 = arith.constant 0 : index
    %34 = vector.load %arg7[%c0_18, %c0_19] : memref<32x1xf32, #tpu.memory_space<vmem>>, vector<32x1xf32>
    %35 = vector.broadcast %34 : vector<32x1xf32> to vector<32x128xf32>
    %36 = arith.addf %33, %35 : vector<32x128xf32>
    %c0_20 = arith.constant 0 : index
    %c0_21 = arith.constant 0 : index
    %37 = vector.load %arg8[%c0_20, %c0_21] : memref<32x128xf32, #tpu.memory_space<vmem>>, vector<32x128xf32>
    tpu.vector_store %arg8[%c0_20, %c0_21], %36 {strides = array<i32>} : memref<32x128xf32, #tpu.memory_space<vmem>>, vector<32x128xf32>,
    return
  }
  func.func @transform_0(%arg0: i32) -> (i32, i32) {
    %c0_i32 = arith.constant 0 : i32
    %c0_i32_0 = arith.constant 0 : i32
    return %c0_i32, %arg0 : i32, i32
  }
  func.func @transform_1(%arg0: i32) -> (i32, i32) {
    %c0_i32 = arith.constant 0 : i32
    %c0_i32_0 = arith.constant 0 : i32
    %c0_i32_1 = arith.constant 0 : i32
    return %c0_i32, %c0_i32_0 : i32, i32
  }
  func.func @transform_2(%arg0: i32) -> (i32, i32) {
    %c0_i32 = arith.constant 0 : i32
    %c0_i32_0 = arith.constant 0 : i32
    %c0_i32_1 = arith.constant 0 : i32
    return %c0_i32, %c0_i32_0 : i32, i32
  }
  func.func @transform_3(%arg0: i32) -> (i32, i32) {
    %c0_i32 = arith.constant 0 : i32
    %c0_i32_0 = arith.constant 0 : i32
    %c0_i32_1 = arith.constant 0 : i32
    return %c0_i32, %c0_i32_0 : i32, i32
  }
  func.func @transform_4(%arg0: i32) -> (i32, i32) {
    %c0_i32 = arith.constant 0 : i32
    %c0_i32_0 = arith.constant 0 : i32
    %c0_i32_1 = arith.constant 0 : i32
    return %c0_i32, %c0_i32_0 : i32, i32
  }
  func.func @transform_5(%arg0: i32) -> (i32, i32) {
    %c0_i32 = arith.constant 0 : i32
    %c0_i32_0 = arith.constant 0 : i32
    %c0_i32_1 = arith.constant 0 : i32
    return %c0_i32, %c0_i32_0 : i32, i32
  }
  func.func @transform_6(%arg0: i32) -> (i32, i32) {
    %c0_i32 = arith.constant 0 : i32
    %c0_i32_0 = arith.constant 0 : i32
    %c0_i32_1 = arith.constant 0 : i32
    return %c0_i32, %c0_i32_0 : i32, i32
  }
  func.func @transform_7(%arg0: i32) -> (i32, i32) {
    %c0_i32 = arith.constant 0 : i32
    %c0_i32_0 = arith.constant 0 : i32
    return %c0_i32, %arg0 : i32, i32
  }
}

</mosaic_0001>

<bundles_post_ra>
// kernel: tpu_custom_call.1
= control target key start
LH: loop header
LB: loop body
LE: loop exit
PB: predicated region body
PF: predicated region fallthrough
CT: control target
= control target key end

     0   :  { %12 = vsyncpa [#allocation4], 0  ;;  %s1315_s0 = inlined_call_operand.vmem [shape: f32[32,512], index: 0, kind: input, shape index: {}]   ;;  %s1316_s1 = inlined_call_operand.vmem [shape: f32[64,32], index: 1, kind: input, shape index: {}]   ;;  %s1317_s2 = inlined_call_operand.vmem [shape: f32[64,1], index: 2, kind: input, shape index: {}]   ;;  %s1318_s3 = inlined_call_operand.vmem [shape: f32[32,64], index: 3, kind: input, shape index: {}]   ;;  %s1319_s4 = inlined_call_operand.vmem [shape: f32[32,1], index: 4, kind: input, shape index: {}]   ;;  %s1320_s5 = inlined_call_operand.vmem [shape: f32[32,1], index: 5, kind: input, shape index: {}]   ;;  %s1321_s6 = inlined_call_operand.vmem [shape: f32[32,1], index: 6, kind: input, shape index: {}]   ;;  %s1322_s7 = inlined_call_operand.hbm [shape: f32[32,512], index: 7, kind: output, shape index: {}]  }
   0x1   :  { %14 = vsyncpa [#allocation4 + $0x1], 0  ;;  %s1094_s24 = smov 0   ;;  %s1096_s25 = smov 0  }
   0x2   :  { %s1098_s26 = smov 0   ;;  %s1100_s27 = smov 0  }
   0x3 LB: > { %s823_s28 = sadd.s32 4294967295, %s1047_s27   ;;  %s824_s29 = sadd.s32 4294967294, %s1047_s27   ;;  %s1047_s27 = sphi %s1100_s27, %s1328_s27   ;;  %s1043_s26 = sphi %s1098_s26, %s1327_s26   ;;  %s1039_s25 = sphi %s1096_s25, %s1326_s25   ;;  %s1035_s24 = sphi %s1094_s24, %s1325_s24  }
   0x4   : > { %s1117_s30 = sadd.s32 1, %s1047_s27   ;;  %s27_s8 = sadd.s32 1, %s1043_s26 }
   0x5   : > { %s24_s9 = ssub.s32 %s1047_s27, %s1117_s30  ;;  %p34_p0 = scmp.ne.s32.totalorder %s1043_s26, %s1039_s25 }
   0x6   : > { %p25_p1 = scmp.eq.s32.totalorder %s24_s9, 0  ;;  %p35_p2 = scmp.eq.s32.totalorder %s1047_s27, 0 }
   0x7   : > { %p190_p3 = scmp.eq.s32.totalorder %s823_s28, 3  ;;  %p195_p4 = scmp.ne.s32.totalorder %s1039_s25, %s1035_s24 }
   0x8   : > { %s1130_s10 = scalar_select %p25_p1, %s1043_s26, %s27_s8  }
   0x9   : > { %p36_p5 = por %p35_p2, %p34_p0  ;;  %p1132_p6 = por %p190_p3, %p34_p0 }
   0xa   : > { %p196_p7 = scmp.eq.s32.totalorder %s824_s29, 3  ;;  %p826_p9 = scmp.ge.s32.totalorder %s1047_s27, 4 }
   0xc   : > { %p1136_p8 = por %p196_p7, %p195_p4  ;;  %230 = sbr.rel (%p826_p9) target bundleno = 27 (0x1b), region = 40 }
  0x13   : > { %233 = sbr.rel (!%p36_p5) target bundleno = 27 (0x1b), region = 44  ;;  %s235_s13 = sand.u32 (%p36_p5), 1, %s1043_s26  }
  0x14   : > { %s828_s14 = sshll.u32 (%p36_p5), %s1047_s27, 3  ;;  %s827_s15 = sshll.u32 (%p36_p5), %s235_s13, 5 }
  0x15   : > { %s239_s18 = scalar_lea.vmem (%p36_p5), %s1315_s0, %s828_s14  ;;  %s237_s19 = scalar_lea.vmem (%p36_p5), [#allocation2], %s827_s15 }
  0x16   : > { %v273_v0 = vld [vmem:[%s239_s18] sm:$0xff] (%p36_p5) }
  0x17   : > { %v275_v1 = vld [vmem:[%s239_s18 + $0x20] sm:$0xff] (%p36_p5)  ;;  %274 = vst [vmem:[%s237_s19] sm:$0xff] (%p36_p5), %v273_v0 }
  0x18   : > { %v277_v2 = vld [vmem:[%s239_s18 + $0x40] sm:$0xff] (%p36_p5)  ;;  %276 = vst [vmem:[%s237_s19 + $0x8] sm:$0xff] (%p36_p5), %v275_v1 }
  0x19   : > { %278 = vst [vmem:[%s237_s19 + $0x10] sm:$0xff] (%p36_p5), %v277_v2  ;;  %v279_v3 = vld [vmem:[%s239_s18 + $0x60] sm:$0xff] (%p36_p5) }
  0x1a   : > { %280 = vst [vmem:[%s237_s19 + $0x18] sm:$0xff] %v279_v3 }
  0x1b PF: > { %p829_p10 = scmp.ge.s32.totalorder %s1047_s27, 1  ;;  %p285_p11 = scmp.lt.s32.totalorder %s1047_s27, 5 }
  0x1d   : > { %p286_p12 = pnand %p829_p10, %p285_p11 }
  0x1e   : > { %s292_s20 = sand.u32 (!%p286_p12), 1, %s1039_s25   ;;  %v327_v4 = vld [vmem:[%s1316_s1] sm:$0xff] (!%p286_p12)  ;;  %vm383_vm0 = vcmask (!%p286_p12), 261120   ;;  %v1049_v5 = vmov (!%p286_p12), 0   ;;  %v337_v12 = vld [vmem:[%s1317_s2 + $0x10] sm:$0xff] (!%p286_p12)  ;;  %v336_v13 = vld [vmem:[%s1317_s2 + $0x8] sm:$0xff] (!%p286_p12) }
  0x1f   : > { %289 = sbr.rel (%p286_p12) target bundleno = 556 (0x22c), region = 82  ;;  %s1154_s23 = sshll.u32 (!%p286_p12), %s292_s20, 5  ;;  %880 = vmatprep.mubr.msk.f32.mxu0 (!%p286_p12), %vm383_vm0, %v327_v4  ;;  %981 = vset.pattern.permute.xlu0 (!%p286_p12), %v1049_v5  ;;  %v335_v6 = vld [vmem:[%s1317_s2] sm:$0xff] (!%p286_p12)  ;;  %v338_v15 = vld [vmem:[%s1317_s2 + $0x18] sm:$0xff] (!%p286_p12)  ;;  %v340_v17 = vld [vmem:[%s1317_s2 + $0x28] sm:$0xff] (!%p286_p12)  ;;  %vm549_vm1 = vcmask (!%p286_p12), 523264  }
  0x20   : > { %982 = vset.pattern.permute.xlu1 (!%p286_p12), %v1049_v5  ;;  %s294_s9 = scalar_lea.vmem (!%p286_p12), [#allocation2], %s1154_s23  ;;  %345 = vperm.xlu0 (!%p286_p12), %981, %v335_v6   ;;  %v339_v16 = vld [vmem:[%s1317_s2 + $0x20] sm:$0xff] (!%p286_p12)  ;;  %v328_v18 = vld [vmem:[%s1316_s1 + $0x8] sm:$0xff] (!%p286_p12)  ;;  %v329_v19 = vld [vmem:[%s1316_s1 + $0x10] sm:$0xff] (!%p286_p12)  ;;  %s322_s13 = scalar_lea.vmem (!%p286_p12), [#allocation3], %s1154_s23 }
  0x21   : > { %v323_v7 = vld [vmem:[%s294_s9] sm:$0xff] (!%p286_p12)  ;;  %v324_v8 = vld [vmem:[%s294_s9 + $0x8] sm:$0xff] (!%p286_p12)  ;;  %v325_v9 = vld [vmem:[%s294_s9 + $0x10] sm:$0xff] (!%p286_p12)  ;;  %355 = vperm.xlu1 (!%p286_p12), %982, %v337_v12   ;;  %s756_s14 = sshll.u32 (!%p286_p12), %s322_s13, 4  ;;  %s845_s15 = sshll.u32 (!%p286_p12), %s823_s28, 7  ;;  %s1265_s14 = int_to_ptr.vmem [resolvable:$true] %s756_s14 }
  0x22   : > { %v914_v10 = vpack.c.bf16 (!%p286_p12), %v324_v8, %v323_v7  ;;  %v326_v11 = vld [vmem:[%s294_s9 + $0x18] sm:$0xff] (!%p286_p12)  ;;  %v341_v20 = vld [vmem:[%s1317_s2 + $0x30] sm:$0xff] (!%p286_p12)  ;;  %v331_v23 = vld [vmem:[%s1316_s1 + $0x20] sm:$0xff] (!%p286_p12)  ;;  %s1270_s17 = scalar_lea.hbm (!%p286_p12), %s1322_s7, %s845_s15  ;;  %s1274_s28 = scalar_lea.sflag (!%p286_p12), [#allocation4], %s292_s20 }
  0x23   : > { %v918_v14 = vpack.c.bf16 (!%p286_p12), %v326_v11, %v325_v9  ;;  %v342_v21 = vld [vmem:[%s1317_s2 + $0x38] sm:$0xff] (!%p286_p12)  ;;  %v525_v24 = vld [vmem:[%s1319_s4] sm:$0xff] (!%p286_p12)  ;;  %v526_v25 = vld [vmem:[%s1319_s4 + $0x8] sm:$0xff] (!%p286_p12)  ;;  %s985_s18 = scalar_lea.vmem (!%p286_p12), %s1265_s14, 512  ;;  %s1050_s19 = smov (!%p286_p12), [#allocation3]  }
  0x24   : > { %915 = vmatprep.subr.bf16.mxu0 (!%p286_p12), %v914_v10  ;;  %350 = vperm.xlu0 (!%p286_p12), %981, %v336_v13   ;;  %v330_v22 = vld [vmem:[%s1316_s1 + $0x18] sm:$0xff] (!%p286_p12)  ;;  %v332_v26 = vld [vmem:[%s1316_s1 + $0x28] sm:$0xff] (!%p286_p12)  ;;  %v333_v27 = vld [vmem:[%s1316_s1 + $0x30] sm:$0xff] (!%p286_p12)  ;;  %p986_p13 = scmp.ne.s32.totalorder (!%p286_p12), %s1265_s14, %s985_s18  ;;  %s989_s21 = sshll.u32 (!%p286_p12), %s1050_s19, 4  ;;  %s990_s21 = int_to_ptr.vmem [resolvable:$false] %s989_s21 }
  0x25   : > { %917 = vmatpush3.bf16.msra.mxu0 (!%p286_p12), %v914_v10  ;;  %360 = vperm.xlu1 (!%p286_p12), %982, %v338_v15   ;;  %v527_v28 = vld [vmem:[%s1319_s4 + $0x10] sm:$0xff] (!%p286_p12)  ;;  %v528_v29 = vld [vmem:[%s1319_s4 + $0x18] sm:$0xff] (!%p286_p12)  ;;  %v683_v31 = vld [vmem:[%s1320_s5] sm:$0xff] (!%p286_p12)  ;;  %s991_s22 = scalar_lea.vmem (!%p286_p12), %s990_s21, 1024  ;;  %p992_p2 = scmp.lt.s32.totalorder (!%p286_p12), %s1265_s14, %s990_s21 }
  0x26   : > { %919 = vmatprep.subr.bf16.mxu0 %v918_v14  ;;  %v334_v30 = vld [vmem:[%s1316_s1 + $0x38] sm:$0xff]  ;;  %v684_v32 = vld [vmem:[%s1320_s5 + $0x8] sm:$0xff]  ;;  %v685_v33 = vld [vmem:[%s1320_s5 + $0x10] sm:$0xff]  ;;  %p987_p0 = pnand %p986_p13, %p1132_p6  ;;  %p993_p3 = scmp.lt.s32.totalorder %s991_s22, %s985_s18 }
  0x27   : > { %v686_v34 = vld [vmem:[%s1320_s5 + $0x18] sm:$0xff]  ;;  %v711_v35 = vld [vmem:[%s1321_s6] sm:$0xff]  ;;  %v712_v36 = vld [vmem:[%s1321_s6 + $0x8] sm:$0xff] }
  0x28   : > { %365 = vperm.xlu0 %981, %v339_v16   ;;  %v713_v37 = vld [vmem:[%s1321_s6 + $0x10] sm:$0xff]  ;;  %v714_v38 = vld [vmem:[%s1321_s6 + $0x18] sm:$0xff]  ;;  %v521_v39 = vld [vmem:[%s1318_s3] sm:$0xff]  ;;  %p988_p1 = pneg %p987_p0  ;;  %p994_p4 = por %p993_p3, %p992_p2 }
  0x29   : > { %921 = vmatpush3.bf16.msra.mxu0 %v918_v14  ;;  %370 = vperm.xlu1 %982, %v340_v17   ;;  %v522_v12 = vld [vmem:[%s1318_s3 + $0x8] sm:$0xff]  ;;  %v523_v13 = vld [vmem:[%s1318_s3 + $0x10] sm:$0xff]  ;;  %v524_v14 = vld [vmem:[%s1318_s3 + $0x18] sm:$0xff] }
  0x2a   : > { %908 = vmatprep.mubr.msk.f32.mxu1 %vm549_vm1, %v521_v39  ;;  %p995_p5 = pnand %p994_p4, %p988_p1 }
  0x2c   : > { %881 = vmatmul.mubr.msk.f32.vlgmr.msra.gmra.mrb[0].mxu0 %vm383_vm0, %v328_v18  ;;  %375 = vperm.xlu0 %981, %v341_v20  }
  0x2d   : > { %883 = vmatprep.mubr.msk.f32.mxu0 %vm383_vm0, %v329_v19  ;;  %380 = vperm.xlu1 %982, %v342_v21  }
  0x30   : > { %884 = vmatmul.mubr.msk.f32.gmra.mrb[2].mxu0 %vm383_vm0, %v330_v22  ;;  %531 = vperm.xlu0 %981, %v525_v24  }
  0x31   : > { %886 = vmatprep.mubr.msk.f32.mxu0 %vm383_vm0, %v331_v23  ;;  %536 = vperm.xlu1 %982, %v526_v25  }
  0x34   : > { %887 = vmatmul.mubr.msk.f32.gmra.mrb[4].mxu0 %vm383_vm0, %v332_v26  ;;  %541 = vperm.xlu0 %981, %v527_v28  }
  0x35   : > { %889 = vmatprep.mubr.msk.f32.mxu0 %vm383_vm0, %v333_v27  ;;  %546 = vperm.xlu1 %982, %v528_v29  }
  0x38   : > { %890 = vmatmul.mubr.msk.f32.gmra.mrb[6].mxu0 %vm383_vm0, %v334_v30  ;;  %689 = vperm.xlu0 %981, %v683_v31  }
  0x39   : > { %694 = vperm.xlu1 %982, %v684_v32  }
  0x3c   : > { %699 = vperm.xlu0 %981, %v685_v33  }
  0x3d   : > { %704 = vperm.xlu1 %982, %v686_v34  }
  0x40   : > { %717 = vperm.xlu0 %981, %v711_v35  }
  0x41   : > { %722 = vperm.xlu1 %982, %v712_v36  }
  0x44   : > { %727 = vperm.xlu0 %981, %v713_v37  }
  0x45   : > { %732 = vperm.xlu1 %982, %v714_v38  }
  0x9f   : > { %v346_v40 = vpop.permute.xlu0 %345 }
  0xa0   : > { %v356_v41 = vpop.permute.xlu1 %355 }
  0xa3   : > { %v351_v42 = vpop.permute.xlu0 %350 }
  0xa4   : > { %v361_v43 = vpop.permute.xlu1 %360 }
  0xa7   : > { %v366_v56 = vpop.permute.xlu0 %365 }
  0xa8   : > { %v371_v53 = vpop.permute.xlu1 %370 }
  0xab   : > { %v376_v4 = vpop.permute.xlu0 %375 }
  0xac   : > { %v381_v1 = vpop.permute.xlu1 %380 }
  0xaf   : > { %v532_v15 = vpop.permute.xlu0 %531 }
  0xb0   : > { %v537_v16 = vpop.permute.xlu1 %536 }
  0xb3   : > { %v542_v22 = vpop.permute.xlu0 %541 }
  0xb4   : > { %v547_v26 = vpop.permute.xlu1 %546 }
  0xff   : > { %v882_v44 = vpop.f32.mrb[0].mxu0 }
 0x100   : > { %v480_v45 = vadd.f32 %v882_v44, %v351_v42  ;;  %v474_v46 = vpop.f32.mrb[1].mxu0 }
 0x101   : > { %v475_v47 = vadd.f32 %v474_v46, %v346_v40 }
 0x102   : > { %v514_v48 = vmax.f32 %v480_v45, 0.0 }
 0x103   : > { %v513_v49 = vmax.f32 %v475_v47, 0.0  ;;  %v885_v50 = vpop.f32.mrb[2].mxu0 }
 0x104   : > { %v490_v51 = vadd.f32 %v885_v50, %v361_v43  ;;  %v484_v52 = vpop.f32.mrb[3].mxu0 }
 0x105   : > { %v485_v54 = vadd.f32 %v484_v52, %v356_v41  ;;  %v922_v55 = vpack.c.bf16 %v514_v48, %v513_v49 }
 0x106   : > { %v516_v57 = vmax.f32 %v490_v51, 0.0 }
 0x107   : > { %v515_v58 = vmax.f32 %v485_v54, 0.0  ;;  %v888_v59 = vpop.f32.mrb[4].mxu0  ;;  %923 = vmatprep.subr.bf16.mxu1 %v922_v55 }
 0x108   : > { %v500_v60 = vadd.f32 %v888_v59, %v371_v53  ;;  %v494_v61 = vpop.f32.mrb[5].mxu0  ;;  %925 = vmatpush3.bf16.msra.mxu1 %v922_v55 }
 0x109   : > { %v926_v62 = vpack.c.bf16 %v516_v57, %v515_v58  ;;  %v495_v63 = vadd.f32 %v494_v61, %v366_v56  ;;  %v690_v56 = vpop.permute.xlu0 %689  ;;  %v695_v57 = vpop.permute.xlu1 %694 }
 0x10a   : > { %v518_v0 = vmax.f32 %v500_v60, 0.0 }
 0x10b   : > { %v517_v2 = vmax.f32 %v495_v63, 0.0  ;;  %v891_v3 = vpop.f32.mrb[6].mxu0  ;;  %927 = vmatprep.subr.bf16.mxu1 %v926_v62 }
 0x10c   : > { %v510_v5 = vadd.f32 %v891_v3, %v381_v1  ;;  %v504_v6 = vpop.f32.mrb[7].mxu0  ;;  %929 = vmatpush3.bf16.msra.mxu1 %v926_v62 }
 0x10d   : > { %v930_v7 = vpack.c.bf16 %v518_v0, %v517_v2  ;;  %v505_v8 = vadd.f32 %v504_v6, %v376_v4  ;;  %v700_v60 = vpop.permute.xlu0 %699  ;;  %v705_v61 = vpop.permute.xlu1 %704 }
 0x10e   : > { %v520_v9 = vmax.f32 %v510_v5, 0.0 }
 0x10f   : > { %v519_v10 = vmax.f32 %v505_v8, 0.0  ;;  %931 = vmatprep.subr.bf16.mxu1 %v930_v7 }
 0x110   : > { %933 = vmatpush3.bf16.msra.mxu1 %v930_v7 }
 0x111   : > { %v934_v11 = vpack.c.bf16 %v520_v9, %v519_v10  ;;  %v718_v62 = vpop.permute.xlu0 %717  ;;  %v723_v63 = vpop.permute.xlu1 %722 }
 0x113   : > { %935 = vmatprep.subr.bf16.mxu1 %v934_v11 }
 0x114   : > { %937 = vmatpush3.bf16.msra.mxu1 %v934_v11 }
 0x115   : > { %v728_v9 = vpop.permute.xlu0 %727  ;;  %v733_v10 = vpop.permute.xlu1 %732 }
 0x117   : > { %909 = vmatmul.mubr.msk.f32.vlgmr.msra.gmra.mrb[0].mxu1 %vm549_vm1, %v522_v12 }
 0x118   : > { %911 = vmatprep.mubr.msk.f32.mxu1 %vm549_vm1, %v523_v13 }
 0x11b   : > { %912 = vmatmul.mubr.msk.f32.gmra.mrb[2].mxu1 %vm549_vm1, %v524_v14 }
 0x1ea   : > { %v910_v17 = vpop.f32.mrb[0].mxu1 }
 0x1eb   : > { %v634_v18 = vadd.f32 %v910_v17, %v537_v16  ;;  %v628_v19 = vpop.f32.mrb[1].mxu1 }
 0x1ec   : > { %v629_v20 = vadd.f32 %v628_v19, %v532_v15 }
 0x1ed   : > { %v657_v21 = vmul.f32 %v634_v18, %v634_v18 }
 0x1ee   : > { %v647_v23 = vadd.f32 %v634_v18, %v629_v20  ;;  %v656_v24 = vmul.f32 %v629_v20, %v629_v20  ;;  %v913_v25 = vpop.f32.mrb[2].mxu1 }
 0x1ef   : > { %v638_v27 = vpop.f32.mrb[3].mxu1  ;;  %v644_v29 = vadd.f32 %v913_v25, %v547_v26 }
 0x1f0   : > { %v660_v28 = vadd.f32 %v657_v21, %v656_v24  ;;  %v639_v30 = vadd.f32 %v638_v27, %v542_v22 }
 0x1f1   : > { %v659_v33 = vmul.f32 %v644_v29, %v644_v29 }
 0x1f2   : > { %v648_v31 = vadd.f32 %v647_v23, %v639_v30  ;;  %v658_v32 = vmul.f32 %v639_v30, %v639_v30 }
 0x1f4   : > { %v649_v34 = vadd.f32 %v648_v31, %v644_v29  ;;  %v661_v35 = vadd.f32 %v660_v28, %v658_v32 }
 0x1f6   : > { %v650_v36 = vrot.slane %v649_v34, 4  ;;  %v662_v37 = vadd.f32 %v661_v35, %v659_v33 }
 0x1f8   : > { %v651_v38 = vadd.f32 %v650_v36, %v649_v34  ;;  %v663_v39 = vrot.slane %v662_v37, 4 }
 0x1fa   : > { %v652_v40 = vrot.slane %v651_v38, 2  ;;  %v664_v41 = vadd.f32 %v663_v39, %v662_v37 }
 0x1fc   : > { %v653_v42 = vadd.f32 %v652_v40, %v651_v38  ;;  %v665_v43 = vrot.slane %v664_v41, 2 }
 0x1fe   : > { %v654_v44 = vrot.slane %v653_v42, 1  ;;  %v666_v45 = vadd.f32 %v665_v43, %v664_v41 }
 0x200   : > { %v655_v46 = vadd.f32 %v654_v44, %v653_v42  ;;  %v667_v47 = vrot.slane %v666_v45, 1 }
 0x202   : > { %v668_v48 = vadd.f32 %v667_v47, %v666_v45  ;;  %v669_v49 = vmul.f32 0.03125, %v655_v46 }
 0x204   : > { %v670_v50 = vmul.f32 0.03125, %v668_v48  ;;  %v671_v51 = vmul.f32 %v669_v49, %v669_v49  ;;  %v673_v52 = vsub.f32 %v629_v20, %v669_v49  ;;  %v674_v53 = vsub.f32 %v634_v18, %v669_v49 }
 0x205   : > { %v675_v54 = vsub.f32 %v639_v30, %v669_v49  ;;  %v676_v55 = vsub.f32 %v644_v29, %v669_v49 }
 0x206   : > { %v672_v58 = vsub.f32 %v670_v50, %v671_v51 }
 0x208   : > { %v677_v59 = vadd.f32 1e-05, %v672_v58 }
 0x20a   : > { %983 = vrsqrt.f32 %v677_v59 }
 0x214   : > { %v984_v0 = vpop.eup %983 }
 0x215   : > { %v679_v1 = vmul.f32 %v984_v0, %v673_v52  ;;  %v680_v2 = vmul.f32 %v984_v0, %v674_v53  ;;  %v681_v3 = vmul.f32 %v984_v0, %v675_v54  ;;  %v682_v4 = vmul.f32 %v984_v0, %v676_v55 }
 0x217   : > { %v709_v5 = vmul.f32 %v700_v60, %v681_v3  ;;  %v707_v6 = vmul.f32 %v690_v56, %v679_v1  ;;  %v708_v7 = vmul.f32 %v695_v57, %v680_v2  ;;  %v710_v8 = vmul.f32 %v705_v61, %v682_v4 }
 0x219   : > { %v737_v11 = vadd.f32 %v728_v9, %v709_v5  ;;  %v735_v12 = vadd.f32 %v718_v62, %v707_v6  ;;  %v736_v13 = vadd.f32 %v723_v63, %v708_v7  ;;  %v738_v14 = vadd.f32 %v733_v10, %v710_v8 }
 0x21b   : > { %741 = vst [vmem:[%s322_s13 + $0x10] sm:$0xff] %v737_v11  ;;  %739 = vst [vmem:[%s322_s13] sm:$0xff] %v735_v12 }
 0x21c   : > { %740 = vst [vmem:[%s322_s13 + $0x8] sm:$0xff] %v736_v13  ;;  %742 = vst [vmem:[%s322_s13 + $0x18] sm:$0xff] %v738_v14 }
 0x21d   : > { %998 = shalt.err (!%p995_p5)
}
 0x21e   : > { %s999_s20 = scalar_lea.hbm %s1270_s17, 512  ;;  %s1003_s9 = scalar_lea.hbm %s1322_s7, 2048 }
 0x21f   : > { %p1000_p7 = scmp.ne.s32.totalorder %s1270_s17, %s999_s20  ;;  %p1004_p11 = scmp.lt.u32.totalorder %s1270_s17, %s1322_s7 }
 0x220   : > { %p1005_p12 = scmp.lt.u32.totalorder %s1003_s9, %s999_s20  ;;  %p1007_p0 = scmp.lt.u32.totalorder %s999_s20, %s1270_s17 }
 0x221   : > { %p1001_p9 = pnand %p1000_p7, %p1132_p6 }
 0x222   : > { %p1006_p13 = por %p1005_p12, %p1004_p11 }
 0x223   : > { %p1002_p10 = pneg %p1001_p9 }
 0x224   : > { %p1008_p1 = por %p1007_p0, %p1006_p13 }
 0x226   : > { %p1009_p2 = pnand %p1008_p1, %p1002_p10 }
 0x228   : > { %1012 = shalt.err (!%p1009_p2)
}
 0x229   : > { %s1051_s23 = smov 128   ;;  %s1052_s16 = smov 512  }
 0x22a   : > { %s1053_s18 = smov 8  }
 0x22b   : > { %938 = dma.vmem_to_hbm [thread:$0]  (%p1132_p6), %s1265_s14, 512, %s1270_s17, %s1274_s28, %s1051_s23, %s1052_s16, %s1053_s18  }
 0x22c PF: > { %p944_p3 = scmp.ge.s32.totalorder %s1047_s27, 2  ;;  %s771_s19 = sand.u32 1, %s1035_s24  }
 0x22d   : > { %s772_s21 = scalar_lea.sflag [#allocation4], %s771_s19 }
 0x22e   : > { %p941_p4 = pnand %p944_p3, %p1136_p8 }
 0x230   : > { %1030 = dma.done.wait (!%p941_p4), %s772_s21, 512  }
 0x231   : > { %1032 = vsyncadd (!%p941_p4), %s772_s21, 4294966784  ;;  %p17_p5 = scmp.ge.s32.totalorder %s1117_s30, 6   ;;  %s1325_s24 = smov %s1039_s25 }
 0x232   : > { %s1326_s25 = smov %s1043_s26  ;;  %s1327_s26 = smov %s1130_s10 }
 0x233   : > { %s1328_s27 = smov %s1117_s30  ;;  %19 = sbr.rel (!%p17_p5) target bundleno = 3 (0x3), region = 126 }
 0x23a   :  { %777 = vsyncpa [#allocation4], 1 }
 0x23b   :  { %779 = vsyncpa [#allocation4 + $0x1], 1 }

</bundles_post_ra>
